<compile_context>
chip_gen: v7x
topology: tpu7x:2x2x1
jax: 0.10.0
libtpu: 0.0.40
codegen_flags: <defaults>
</compile_context>

<pallas_src>
import functools

import jax
import jax.numpy as jnp
from jax import lax
from jax.experimental import pallas as pl
from jax.experimental.pallas import tpu as pltpu


def _cnn_kernel(xe_ref, xo_ref, w1_ref, b1_ref, w2_ref, b2_ref, wf_ref, bf_ref,
                out_ref, shift_scr, *, bt, wh, w2out):
    n = bt * wh                                   # flattened (batch, pooled-pos) rows

    def shift_up1(x):
        # y[i] = x[i + 1].  Rows that read past a sample's segment (or past the
        # written region) are garbage and are masked before the global max.
        r, c = x.shape
        shift_scr[pl.ds(0, r), pl.ds(0, c)] = x
        return shift_scr[pl.ds(1, r), pl.ds(0, c)]

    xe = xe_ref[...]                              # (n, 96) bf16, even time cols
    xo = xo_ref[...]                              # (n, 96) bf16, odd  time cols
    w1 = w1_ref[...]                              # (96, 384) bf16 = 3 conv1 taps

    # conv1: each tap is a (96 -> 128) matmul; all 3 taps in one MXU call per
    # parity.  h1[2i] / h1[2i+1] are then assembled with one-row shifts.
    he = jnp.dot(xe, w1, preferred_element_type=jnp.float32)   # (n, 384)
    ho = jnp.dot(xo, w1, preferred_element_type=jnp.float32)   # (n, 384)
    e0, e1, e2 = he[:, 0:128], he[:, 128:256], he[:, 256:384]
    o0, o1, o2 = ho[:, 0:128], ho[:, 128:256], ho[:, 256:384]
    h_even = e0 + o1 + shift_up1(e2)              # conv1 at even positions
    h_odd = o0 + shift_up1(e1 + o2)               # conv1 at odd positions

    # MaxPool2d((1,2)) + conv1 bias (added once, after the max).
    pooled = (jnp.maximum(h_even, h_odd) + b1_ref[...]).astype(jnp.bfloat16)

    # conv2 (1,3): full-height matmuls per tap, combined via row shifts:
    #   h2[j] = Y0[j] + Y1[j+1] + Y2[j+2]
    y2 = jnp.dot(pooled, w2_ref[2], preferred_element_type=jnp.float32)
    y1 = jnp.dot(pooled, w2_ref[1], preferred_element_type=jnp.float32)
    y0 = jnp.dot(pooled, w2_ref[0], preferred_element_type=jnp.float32)
    h2 = y0 + shift_up1(y1 + shift_up1(y2))       # (n, 64)

    # Global max over valid conv2 positions (j < w2out) per sample.
    h2 = h2.reshape(bt, wh, 64)
    j = lax.broadcasted_iota(jnp.int32, (bt, wh, 64), 1)
    h2 = jnp.where(j < w2out, h2, -1e30)
    gm = jnp.max(h2, axis=1) + b2_ref[...]        # (bt, 64), conv2 bias here

    # fc: Linear(64, 10), padded to 128 output lanes (lane-dense store).
    out = jnp.dot(gm.astype(jnp.bfloat16), wf_ref[...],
                  preferred_element_type=jnp.float32) + bf_ref[...]
    out_ref[0] = out                              # (bt, 128)


def init_params(key):
    k1, k2, k3, k4, k5, k6 = jax.random.split(key, 6)
    w1 = jax.random.normal(k1, (128, 1, 96, 3), jnp.float32) / jnp.sqrt(96.0 * 3.0)
    b1 = jax.random.normal(k2, (128,), jnp.float32) * 0.01
    w2 = jax.random.normal(k3, (64, 128, 1, 3), jnp.float32) / jnp.sqrt(128.0 * 3.0)
    b2 = jax.random.normal(k4, (64,), jnp.float32) * 0.01
    fw = jax.random.normal(k5, (10, 64), jnp.float32) / jnp.sqrt(64.0)
    fb = jax.random.normal(k6, (10,), jnp.float32) * 0.01
    return dict(w1=w1, b1=b1, w2=w2, b2=b2, fw=fw, fb=fb)


def cnn_baseline_forward(x, p, *, bt=8):
    B, cin, H, W = x.shape
    assert cin == 1 and H == 96, "model expects (B, 1, 96, W) mel-spectrograms"
    assert W >= 8, "need at least 8 time frames"
    KW = 3
    C1, C2, NCLS = 128, 64, 10
    W1OUT = W - KW + 1            # conv1 output width
    WP = W1OUT // 2               # after MaxPool2d((1, 2)) (floor)
    W2OUT = WP - KW + 1           # conv2 output width

    bt = max(1, min(bt, B))
    G = -(-B // bt)               # number of grid steps (>= 2 for large B: v7x)
    B_pad = G * bt

    # Per-sample pooled-position rows held in the kernel; the shifts need rows
    # 0..WP inclusive, round up to a multiple of 16 (bf16 sublane tiling).
    Wh = ((WP + 1 + 15) // 16) * 16
    Wt = 2 * Wh

    # ---- plain-JAX glue (layout only, ~1x input traffic, cast to bf16) ----
    xt = jnp.transpose(x[:, 0, :, :], (0, 2, 1))                 # (B, W, 96)
    pad_w = max(Wt - W, 0)
    xt = jnp.pad(xt, ((0, B_pad - B), (0, pad_w), (0, 0)))
    xe = xt[:, 0:Wt:2, :].reshape(B_pad * Wh, 96).astype(jnp.bfloat16)
    xo = xt[:, 1:Wt:2, :].reshape(B_pad * Wh, 96).astype(jnp.bfloat16)

    # ---- parameter re-layouts (channels last / lane dim) ----
    w1cat = jnp.concatenate([p["w1"][:, 0, :, k].T for k in range(KW)],
                            axis=1).astype(jnp.bfloat16)          # (96, 384)
    b1r = p["b1"].reshape(1, C1).astype(jnp.float32)
    w2t = jnp.stack([p["w2"][:, :, 0, k].T for k in range(KW)],
                    axis=0).astype(jnp.bfloat16)                  # (3, 128, 64)
    b2r = p["b2"].reshape(1, C2).astype(jnp.float32)
    wf_pad = jnp.zeros((C2, 128), jnp.float32).at[:, :NCLS].set(
        p["fw"].T).astype(jnp.bfloat16)                           # (64, 128)
    bf_pad = jnp.zeros((1, 128), jnp.float32).at[:, :NCLS].set(
        p["fb"].reshape(1, NCLS))                                 # (1, 128)

    n_rows = bt * Wh
    kernel = functools.partial(_cnn_kernel, bt=bt, wh=Wh, w2out=W2OUT)
    out = pl.pallas_call(
        kernel,
        out_shape=jax.ShapeDtypeStruct((G, bt, 128), jnp.float32),
        grid=(G,),
        in_specs=[
            pl.BlockSpec((n_rows, 96), lambda g: (g, 0)),
            pl.BlockSpec((n_rows, 96), lambda g: (g, 0)),
            pl.BlockSpec((96, 384), lambda g: (0, 0)),
            pl.BlockSpec((1, C1), lambda g: (0, 0)),
            pl.BlockSpec((KW, C1, C2), lambda g: (0, 0, 0)),
            pl.BlockSpec((1, C2), lambda g: (0, 0)),
            pl.BlockSpec((C2, 128), lambda g: (0, 0)),
            pl.BlockSpec((1, 128), lambda g: (0, 0)),
        ],
        out_specs=pl.BlockSpec((1, bt, 128), lambda g: (g, 0, 0)),
        scratch_shapes=[pltpu.VMEM((n_rows + 8, C1), jnp.float32)],
        compiler_params=pltpu.CompilerParams(
            dimension_semantics=("parallel",)),
    )(xe, xo, w1cat, b1r, w2t, b2r, wf_pad, bf_pad)

    return out.reshape(B_pad, 128)[:B, :NCLS]


def ref_forward(x, p):
    """Pure-JAX f32 reference matching the PyTorch forward exactly."""
    dn = ("NCHW", "OIHW", "NCHW")
    y = lax.conv_general_dilated(x, p["w1"], (1, 1), "VALID", dimension_numbers=dn)
    y = y + p["b1"].reshape(1, -1, 1, 1)
    y = lax.reduce_window(y, -jnp.inf, lax.max, (1, 1, 1, 2), (1, 1, 1, 2), "VALID")
    y = lax.conv_general_dilated(y, p["w2"], (1, 1), "VALID", dimension_numbers=dn)
    y = y + p["b2"].reshape(1, -1, 1, 1)
    y = jnp.max(y, axis=(2, 3))
    return y @ p["fw"].T + p["fb"]


if __name__ == "__main__":
    key = jax.random.PRNGKey(0)
    kx, kp = jax.random.split(key)
    # (B, C, H, W) = (3, 1, 96, 20): 96 mel bins, 20 time frames.
    x = jax.random.normal(kx, (3, 1, 96, 20), jnp.float32)
    params = init_params(kp)

    # bt=2 -> 2 grid steps (exercises batch tiling + batch padding).
    out = cnn_baseline_forward(x, params, bt=2)
    out = jax.block_until_ready(out)

    ref = ref_forward(x, params)
    assert out.shape == (3, 10), out.shape
    # bf16 matmul operands (f32 accumulation) -> relaxed tolerance vs f32 ref.
    err = float(jnp.max(jnp.abs(out - ref)))
    assert jnp.allclose(out, ref, rtol=5e-2, atol=5e-2), (err, out, ref)
    print("KERNEL_OK")
</pallas_src>

<mosaic_0001>
module attributes {stable_mosaic.version = 11 : i64} {
  func.func @_cnn_kernel(%arg0: i32, %arg1: memref<32x96xbf16, #tpu.memory_space<vmem>>, %arg2: memref<32x96xbf16, #tpu.memory_space<vmem>>, %arg3: memref<96x384xbf16, #tpu.memory_space<vmem>>, %arg4: memref<1x128xf32, #tpu.memory_space<vmem>>, %arg5: memref<3x128x64xbf16, #tpu.memory_space<vmem>>, %arg6: memref<1x64xf32, #tpu.memory_space<vmem>>, %arg7: memref<64x128xbf16, #tpu.memory_space<vmem>>, %arg8: memref<1x128xf32, #tpu.memory_space<vmem>>, %arg9: memref<1x2x128xf32, #tpu.memory_space<vmem>>, %arg10: memref<40x128xf32, #tpu.memory_space<vmem>>) attributes {dimension_semantics = [#tpu.dimension_semantics<parallel>], iteration_bounds = array<i64: 2>, scalar_prefetch = 0 : i64, scratch_operands = 1 : i64, tpu.core_type = #tpu.core_type<tc>, window_params = [{transform_indices = @transform_0, window_bounds = array<i64: 32, 96>}, {transform_indices = @transform_1, window_bounds = array<i64: 32, 96>}, {pipeline_mode = #tpu.pipeline_mode<synchronous>, transform_indices = @transform_2, window_bounds = array<i64: 96, 384>}, {pipeline_mode = #tpu.pipeline_mode<synchronous>, transform_indices = @transform_3, window_bounds = array<i64: 1, 128>}, {pipeline_mode = #tpu.pipeline_mode<synchronous>, transform_indices = @transform_4, window_bounds = array<i64: 3, 128, 64>}, {pipeline_mode = #tpu.pipeline_mode<synchronous>, transform_indices = @transform_5, window_bounds = array<i64: 1, 64>}, {pipeline_mode = #tpu.pipeline_mode<synchronous>, transform_indices = @transform_6, window_bounds = array<i64: 64, 128>}, {pipeline_mode = #tpu.pipeline_mode<synchronous>, transform_indices = @transform_7, window_bounds = array<i64: 1, 128>}, {transform_indices = @transform_8, window_bounds = array<i64: 1, 2, 128>}]} {
    %c0 = arith.constant 0 : index
    %c0_0 = arith.constant 0 : index
    %0 = vector.load %arg1[%c0, %c0_0] : memref<32x96xbf16, #tpu.memory_space<vmem>>, vector<32x96xbf16>
    %c0_1 = arith.constant 0 : index
    %c0_2 = arith.constant 0 : index
    %1 = vector.load %arg2[%c0_1, %c0_2] : memref<32x96xbf16, #tpu.memory_space<vmem>>, vector<32x96xbf16>
    %c0_3 = arith.constant 0 : index
    %c0_4 = arith.constant 0 : index
    %2 = vector.load %arg3[%c0_3, %c0_4] : memref<96x384xbf16, #tpu.memory_space<vmem>>, vector<96x384xbf16>
    %cst = arith.constant dense<0.000000e+00> : vector<32x384xf32>
    %3 = tpu.matmul %0, %2, %cst {dimension_numbers = #tpu.dot_dimension_numbers<[1], [0], [0], [1], [0, 0, 1, 1], [], []>} : vector<32x96xbf16>, vector<96x384xbf16>, vector<32x384xf32> -> vector<32x384xf32>
    %cst_5 = arith.constant dense<0.000000e+00> : vector<32x384xf32>
    %4 = tpu.matmul %1, %2, %cst_5 {dimension_numbers = #tpu.dot_dimension_numbers<[1], [0], [0], [1], [0, 0, 1, 1], [], []>} : vector<32x96xbf16>, vector<96x384xbf16>, vector<32x384xf32> -> vector<32x384xf32>
    %5 = vector.extract_strided_slice %3 {offsets = [0, 0], sizes = [32, 128], strides = [1, 1]} : vector<32x384xf32> to vector<32x128xf32>
    %6 = vector.extract_strided_slice %3 {offsets = [0, 128], sizes = [32, 128], strides = [1, 1]} : vector<32x384xf32> to vector<32x128xf32>
    %7 = vector.extract_strided_slice %3 {offsets = [0, 256], sizes = [32, 128], strides = [1, 1]} : vector<32x384xf32> to vector<32x128xf32>
    %8 = vector.extract_strided_slice %4 {offsets = [0, 0], sizes = [32, 128], strides = [1, 1]} : vector<32x384xf32> to vector<32x128xf32>
    %9 = vector.extract_strided_slice %4 {offsets = [0, 128], sizes = [32, 128], strides = [1, 1]} : vector<32x384xf32> to vector<32x128xf32>
    %10 = vector.extract_strided_slice %4 {offsets = [0, 256], sizes = [32, 128], strides = [1, 1]} : vector<32x384xf32> to vector<32x128xf32>
    %11 = arith.addf %5, %9 : vector<32x128xf32>
    %c0_6 = arith.constant 0 : index
    %c0_7 = arith.constant 0 : index
    %12 = vector.load %arg10[%c0_6, %c0_7] : memref<40x128xf32, #tpu.memory_space<vmem>>, vector<32x128xf32>
    tpu.vector_store %arg10[%c0_6, %c0_7], %7 {strides = array<i32>} : memref<40x128xf32, #tpu.memory_space<vmem>>, vector<32x128xf32>,
    %c1 = arith.constant 1 : index
    %c0_8 = arith.constant 0 : index
    %13 = vector.load %arg10[%c1, %c0_8] : memref<40x128xf32, #tpu.memory_space<vmem>>, vector<32x128xf32>
    %14 = arith.addf %11, %13 : vector<32x128xf32>
    %15 = arith.addf %6, %10 : vector<32x128xf32>
    %c0_9 = arith.constant 0 : index
    %c0_10 = arith.constant 0 : index
    %16 = vector.load %arg10[%c0_9, %c0_10] : memref<40x128xf32, #tpu.memory_space<vmem>>, vector<32x128xf32>
    tpu.vector_store %arg10[%c0_9, %c0_10], %15 {strides = array<i32>} : memref<40x128xf32, #tpu.memory_space<vmem>>, vector<32x128xf32>,
    %c1_11 = arith.constant 1 : index
    %c0_12 = arith.constant 0 : index
    %17 = vector.load %arg10[%c1_11, %c0_12] : memref<40x128xf32, #tpu.memory_space<vmem>>, vector<32x128xf32>
    %18 = arith.addf %8, %17 : vector<32x128xf32>
    %19 = arith.maximumf %14, %18 : vector<32x128xf32>
    %c0_13 = arith.constant 0 : index
    %c0_14 = arith.constant 0 : index
    %20 = vector.load %arg4[%c0_13, %c0_14] : memref<1x128xf32, #tpu.memory_space<vmem>>, vector<1x128xf32>
    %21 = vector.broadcast %20 : vector<1x128xf32> to vector<32x128xf32>
    %22 = arith.addf %19, %21 : vector<32x128xf32>
    %23 = arith.truncf %22 : vector<32x128xf32> to vector<32x128xbf16>
    %c2 = arith.constant 2 : index
    %c0_15 = arith.constant 0 : index
    %c0_16 = arith.constant 0 : index
    %24 = vector.load %arg5[%c2, %c0_15, %c0_16] : memref<3x128x64xbf16, #tpu.memory_space<vmem>>, vector<1x128x64xbf16>
    %25 = vector.shape_cast %24 : vector<1x128x64xbf16> to vector<128x64xbf16>
    %cst_17 = arith.constant dense<0.000000e+00> : vector<32x64xf32>
    %26 = tpu.matmul %23, %25, %cst_17 {dimension_numbers = #tpu.dot_dimension_numbers<[1], [0], [0], [1], [0, 0, 1, 1], [], []>} : vector<32x128xbf16>, vector<128x64xbf16>, vector<32x64xf32> -> vector<32x64xf32>
    %c1_18 = arith.constant 1 : index
    %c0_19 = arith.constant 0 : index
    %c0_20 = arith.constant 0 : index
    %27 = vector.load %arg5[%c1_18, %c0_19, %c0_20] : memref<3x128x64xbf16, #tpu.memory_space<vmem>>, vector<1x128x64xbf16>
    %28 = vector.shape_cast %27 : vector<1x128x64xbf16> to vector<128x64xbf16>
    %cst_21 = arith.constant dense<0.000000e+00> : vector<32x64xf32>
    %29 = tpu.matmul %23, %28, %cst_21 {dimension_numbers = #tpu.dot_dimension_numbers<[1], [0], [0], [1], [0, 0, 1, 1], [], []>} : vector<32x128xbf16>, vector<128x64xbf16>, vector<32x64xf32> -> vector<32x64xf32>
    %c0_22 = arith.constant 0 : index
    %c0_23 = arith.constant 0 : index
    %c0_24 = arith.constant 0 : index
    %30 = vector.load %arg5[%c0_22, %c0_23, %c0_24] : memref<3x128x64xbf16, #tpu.memory_space<vmem>>, vector<1x128x64xbf16>
    %31 = vector.shape_cast %30 : vector<1x128x64xbf16> to vector<128x64xbf16>
    %cst_25 = arith.constant dense<0.000000e+00> : vector<32x64xf32>
    %32 = tpu.matmul %23, %31, %cst_25 {dimension_numbers = #tpu.dot_dimension_numbers<[1], [0], [0], [1], [0, 0, 1, 1], [], []>} : vector<32x128xbf16>, vector<128x64xbf16>, vector<32x64xf32> -> vector<32x64xf32>
    %c0_26 = arith.constant 0 : index
    %c0_27 = arith.constant 0 : index
    %33 = vector.load %arg10[%c0_26, %c0_27] : memref<40x128xf32, #tpu.memory_space<vmem>>, vector<32x64xf32>
    tpu.vector_store %arg10[%c0_26, %c0_27], %26 {strides = array<i32>} : memref<40x128xf32, #tpu.memory_space<vmem>>, vector<32x64xf32>,
    %c1_28 = arith.constant 1 : index
    %c0_29 = arith.constant 0 : index
    %34 = vector.load %arg10[%c1_28, %c0_29] : memref<40x128xf32, #tpu.memory_space<vmem>>, vector<32x64xf32>
    %35 = arith.addf %29, %34 : vector<32x64xf32>
    %c0_30 = arith.constant 0 : index
    %c0_31 = arith.constant 0 : index
    %36 = vector.load %arg10[%c0_30, %c0_31] : memref<40x128xf32, #tpu.memory_space<vmem>>, vector<32x64xf32>
    tpu.vector_store %arg10[%c0_30, %c0_31], %35 {strides = array<i32>} : memref<40x128xf32, #tpu.memory_space<vmem>>, vector<32x64xf32>,
    %c1_32 = arith.constant 1 : index
    %c0_33 = arith.constant 0 : index
    %37 = vector.load %arg10[%c1_32, %c0_33] : memref<40x128xf32, #tpu.memory_space<vmem>>, vector<32x64xf32>
    %38 = arith.addf %32, %37 : vector<32x64xf32>
    %39 = vector.shape_cast %38 : vector<32x64xf32> to vector<2x16x64xf32>
    %40 = tpu.iota {dimensions = array<i32: 1>} : vector<2x16x64xi32>
    %c7_i32 = arith.constant 7 : i32
    %41 = vector.broadcast %c7_i32 : i32 to vector<2x16x64xi32>
    %42 = arith.cmpi slt, %40, %41 : vector<2x16x64xi32>
    %cst_34 = arith.constant -1.000000e+30 : f32
    %43 = vector.broadcast %cst_34 : f32 to vector<2x16x64xf32>
    %44 = arith.select %42, %39, %43 : vector<2x16x64xi1>, vector<2x16x64xf32>
    %cst_35 = arith.constant dense<0xFF800000> : vector<2x64xf32>
    %45 = vector.multi_reduction <maximumf>, %44, %cst_35 [1] : vector<2x16x64xf32> to vector<2x64xf32>
    %c0_36 = arith.constant 0 : index
    %c0_37 = arith.constant 0 : index
    %46 = vector.load %arg6[%c0_36, %c0_37] : memref<1x64xf32, #tpu.memory_space<vmem>>, vector<1x64xf32>
    %47 = vector.broadcast %46 : vector<1x64xf32> to vector<2x64xf32>
    %48 = arith.addf %45, %47 : vector<2x64xf32>
    %49 = arith.truncf %48 : vector<2x64xf32> to vector<2x64xbf16>
    %c0_38 = arith.constant 0 : index
    %c0_39 = arith.constant 0 : index
    %50 = vector.load %arg7[%c0_38, %c0_39] : memref<64x128xbf16, #tpu.memory_space<vmem>>, vector<64x128xbf16>
    %cst_40 = arith.constant dense<0.000000e+00> : vector<2x128xf32>
    %51 = tpu.matmul %49, %50, %cst_40 {dimension_numbers = #tpu.dot_dimension_numbers<[1], [0], [0], [1], [0, 0, 1, 1], [], []>} : vector<2x64xbf16>, vector<64x128xbf16>, vector<2x128xf32> -> vector<2x128xf32>
    %c0_41 = arith.constant 0 : index
    %c0_42 = arith.constant 0 : index
    %52 = vector.load %arg8[%c0_41, %c0_42] : memref<1x128xf32, #tpu.memory_space<vmem>>, vector<1x128xf32>
    %53 = vector.broadcast %52 : vector<1x128xf32> to vector<2x128xf32>
    %54 = arith.addf %51, %53 : vector<2x128xf32>
    %c0_43 = arith.constant 0 : index
    %c0_44 = arith.constant 0 : index
    %c0_45 = arith.constant 0 : index
    %55 = vector.load %arg9[%c0_43, %c0_44, %c0_45] : memref<1x2x128xf32, #tpu.memory_space<vmem>>, vector<1x2x128xf32>
    %56 = vector.shape_cast %55 : vector<1x2x128xf32> to vector<2x128xf32>
    %57 = vector.shape_cast %54 : vector<2x128xf32> to vector<1x2x128xf32>
    tpu.vector_store %arg9[%c0_43, %c0_44, %c0_45], %57 {strides = array<i32>} : memref<1x2x128xf32, #tpu.memory_space<vmem>>, vector<1x2x128xf32>,
    return
  }
  func.func @transform_0(%arg0: i32) -> (i32, i32) {
    %c0_i32 = arith.constant 0 : i32
    %c0_i32_0 = arith.constant 0 : i32
    return %arg0, %c0_i32 : i32, i32
  }
  func.func @transform_1(%arg0: i32) -> (i32, i32) {
    %c0_i32 = arith.constant 0 : i32
    %c0_i32_0 = arith.constant 0 : i32
    return %arg0, %c0_i32 : i32, i32
  }
  func.func @transform_2(%arg0: i32) -> (i32, i32) {
    %c0_i32 = arith.constant 0 : i32
    %c0_i32_0 = arith.constant 0 : i32
    %c0_i32_1 = arith.constant 0 : i32
    return %c0_i32, %c0_i32_0 : i32, i32
  }
  func.func @transform_3(%arg0: i32) -> (i32, i32) {
    %c0_i32 = arith.constant 0 : i32
    %c0_i32_0 = arith.constant 0 : i32
    %c0_i32_1 = arith.constant 0 : i32
    return %c0_i32, %c0_i32_0 : i32, i32
  }
  func.func @transform_4(%arg0: i32) -> (i32, i32, i32) {
    %c0_i32 = arith.constant 0 : i32
    %c0_i32_0 = arith.constant 0 : i32
    %c0_i32_1 = arith.constant 0 : i32
    %c0_i32_2 = arith.constant 0 : i32
    return %c0_i32, %c0_i32_0, %c0_i32_1 : i32, i32, i32
  }
  func.func @transform_5(%arg0: i32) -> (i32, i32) {
    %c0_i32 = arith.constant 0 : i32
    %c0_i32_0 = arith.constant 0 : i32
    %c0_i32_1 = arith.constant 0 : i32
    return %c0_i32, %c0_i32_0 : i32, i32
  }
  func.func @transform_6(%arg0: i32) -> (i32, i32) {
    %c0_i32 = arith.constant 0 : i32
    %c0_i32_0 = arith.constant 0 : i32
    %c0_i32_1 = arith.constant 0 : i32
    return %c0_i32, %c0_i32_0 : i32, i32
  }
  func.func @transform_7(%arg0: i32) -> (i32, i32) {
    %c0_i32 = arith.constant 0 : i32
    %c0_i32_0 = arith.constant 0 : i32
    %c0_i32_1 = arith.constant 0 : i32
    return %c0_i32, %c0_i32_0 : i32, i32
  }
  func.func @transform_8(%arg0: i32) -> (i32, i32, i32) {
    %c0_i32 = arith.constant 0 : i32
    %c0_i32_0 = arith.constant 0 : i32
    %c0_i32_1 = arith.constant 0 : i32
    return %arg0, %c0_i32, %c0_i32_0 : i32, i32, i32
  }
}

</mosaic_0001>

<bundles_post_ra>
// kernel: tpu_custom_call.1
= control target key start
LH: loop header
LB: loop body
LE: loop exit
PB: predicated region body
PF: predicated region fallthrough
CT: control target
= control target key end

     0   :  { %13 = vsyncpa [#allocation4], 0  ;;  %s2071_s0 = inlined_call_operand.vmem [shape: bf16[64,96], index: 0, kind: input, shape index: {}]   ;;  %s2072_s1 = inlined_call_operand.vmem [shape: bf16[64,96], index: 1, kind: input, shape index: {}]   ;;  %s2073_s2 = inlined_call_operand.vmem [shape: bf16[96,384], index: 2, kind: input, shape index: {}]   ;;  %s2074_s3 = inlined_call_operand.vmem [shape: f32[1,128], index: 3, kind: input, shape index: {}]   ;;  %s2075_s4 = inlined_call_operand.vmem [shape: bf16[3,128,64], index: 4, kind: input, shape index: {}]   ;;  %s2076_s5 = inlined_call_operand.vmem [shape: f32[1,64], index: 5, kind: input, shape index: {}]   ;;  %s2077_s6 = inlined_call_operand.vmem [shape: bf16[64,128], index: 6, kind: input, shape index: {}]   ;;  %s2078_s7 = inlined_call_operand.vmem [shape: f32[1,128], index: 7, kind: input, shape index: {}]   ;;  %s2079_s8 = inlined_call_operand.hbm [shape: f32[2,2,128], index: 8, kind: output, shape index: {}]  }
   0x1   :  { %15 = vsyncpa [#allocation4 + $0x1], 0  ;;  %s1790_s27 = smov 0   ;;  %s1792_s28 = smov 0  }
   0x2   :  { %s1794_s29 = smov 0   ;;  %s1796_s30 = smov 0  }
   0x3 LB: > { %s1811_s9 = sadd.s32 4294967295, %s1738_s30   ;;  %s1315_s10 = sadd.s32 4294967294, %s1738_s30   ;;  %s1738_s30 = sphi %s1796_s30, %s2085_s30   ;;  %s1734_s29 = sphi %s1794_s29, %s2084_s29   ;;  %s1730_s28 = sphi %s1792_s28, %s2083_s28   ;;  %s1726_s27 = sphi %s1790_s27, %s2082_s27  }
   0x4   : > { %s1815_s11 = sadd.s32 1, %s1738_s30   ;;  %s206_s12 = sadd.s32 1, %s1734_s29 }
   0x5   : > { %s203_s13 = ssub.s32 %s1738_s30, %s1815_s11  ;;  %p216_p0 = scmp.ne.s32.totalorder %s1734_s29, %s1730_s28 }
   0x6   : > { %p204_p1 = scmp.eq.s32.totalorder %s203_s13, 0  ;;  %p217_p2 = scmp.eq.s32.totalorder %s1811_s9, 1 }
   0x7   : > { %p222_p3 = scmp.ne.s32.totalorder %s1730_s28, %s1726_s27  ;;  %p223_p4 = scmp.eq.s32.totalorder %s1315_s10, 1 }
   0x8   : > { %s1826_s14 = scalar_select %p204_p1, %s1734_s29, %s206_s12  }
   0x9   : > { %p1828_p5 = por %p217_p2, %p216_p0  ;;  %p1832_p6 = por %p223_p4, %p222_p3 }
   0xa   : > { %p1318_p7 = scmp.ge.s32.totalorder %s1738_s30, 1  ;;  %p277_p8 = scmp.lt.s32.totalorder %s1738_s30, 3 }
   0xc   : > { %p278_p9 = pnand %p1318_p7, %p277_p8 }
   0xd   : > { %v1620_v0 = vld [vmem:[%s2073_s2 + $0x4] ss:$12 sps:$4 sm:$0xff] (!%p278_p9)   ;;  %s1320_s19 = sshll.u32 (!%p278_p9), %s1811_s9, 2  ;;  %v1622_v1 = vld [vmem:[%s2073_s2 + $0x8] ss:$12 sps:$4 sm:$0xff] (!%p278_p9)   ;;  %v1740_v2 = vmov (!%p278_p9), 0  }
   0xe   : > { %281 = sbr.rel (%p278_p9) target bundleno = 798 (0x31e), region = 52  ;;  %506 = vmatprep.mubr.bf16.mxu0 (!%p278_p9), %v1740_v2  ;;  %474 = vmatprep.subr.bf16.mxu0 (!%p278_p9), %v1620_v0  ;;  %v1623_v3 = vld [vmem:[%s2073_s2] ss:$12 sps:$4 sm:$0xff] (!%p278_p9)   ;;  %p317_p10 = scmp.lt.s32.totalorder (!%p278_p9), %s1320_s19, 7  ;;  %v1624_v4 = vld [vmem:[%s2073_s2 + $0x1c] ss:$12 sps:$4 sm:$0xff] (!%p278_p9)  }
   0xf   : > { %1473 = vmatprep.subr.bf16.mxu1 (!%p278_p9), %v1622_v1  ;;  %475 = vmatpush1.bf16.msra.mxu0 (!%p278_p9), %v1623_v3  ;;  %v1626_v5 = vld [vmem:[%s2073_s2 + $0x20] ss:$12 sps:$4 sm:$0xff] (!%p278_p9)   ;;  %v1627_v6 = vld [vmem:[%s2073_s2 + $0x18] ss:$12 sps:$4 sm:$0xff] (!%p278_p9)   ;;  %v1631_v9 = vld [vmem:[%s2073_s2 + $0x30] ss:$12 sps:$4 sm:$0xff] (!%p278_p9)  }
  0x10   : > { %1474 = vmatpush3.bf16.msra.mxu1 (!%p278_p9), %v1622_v1  ;;  %476 = vmatprep.subr.bf16.mxu0 (!%p278_p9), %v1624_v4  ;;  %v1628_v7 = vld [vmem:[%s2073_s2 + $0x34] ss:$12 sps:$4 sm:$0xff] (!%p278_p9)   ;;  %v1630_v8 = vld [vmem:[%s2073_s2 + $0x38] ss:$12 sps:$4 sm:$0xff] (!%p278_p9)   ;;  %v1634_v11 = vld [vmem:[%s2073_s2 + $0x50] ss:$12 sps:$4 sm:$0xff] (!%p278_p9)  }
  0x11   : > { %1475 = vmatprep.subr.bf16.mxu1 (!%p278_p9), %v1626_v5  ;;  %v1632_v10 = vld [vmem:[%s2073_s2 + $0x4c] ss:$12 sps:$4 sm:$0xff] (!%p278_p9)   ;;  %v1635_v12 = vld [vmem:[%s2073_s2 + $0x48] ss:$12 sps:$4 sm:$0xff] (!%p278_p9)   ;;  %v1636_v13 = vld [vmem:[%s2073_s2 + $0x64] ss:$12 sps:$4 sm:$0xff] (!%p278_p9)  }
  0x12   : > { %v1638_v14 = vld [vmem:[%s2073_s2 + $0x68] ss:$12 sps:$4 sm:$0xff] (!%p278_p9)   ;;  %vm467_vm0 = vcmask (!%p278_p9), 785408   ;;  %v1639_v16 = vld [vmem:[%s2073_s2 + $0x60] ss:$12 sps:$4 sm:$0xff] (!%p278_p9)   ;;  %v1654_v29 = vld [vmem:[%s2075_s4 + $0x98] sm:$0xff] (!%p278_p9)  }
  0x13   : > { %477 = vmatpush1.bf16.msra.mxu0 (!%p278_p9), %v1627_v6  ;;  %v1640_v17 = vld [vmem:[%s2073_s2 + $0x7c] ss:$12 sps:$4 sm:$0xff] (!%p278_p9)   ;;  %v1642_v18 = vld [vmem:[%s2073_s2 + $0x80] ss:$12 sps:$4 sm:$0xff] (!%p278_p9)   ;;  %v1643_v19 = vld [vmem:[%s2073_s2 + $0x78] ss:$12 sps:$4 sm:$0xff] (!%p278_p9)  }
  0x14   : > { %1476 = vmatpush3.bf16.msra.mxu1 (!%p278_p9), %v1626_v5  ;;  %478 = vmatprep.subr.bf16.mxu0 (!%p278_p9), %v1628_v7  ;;  %v1648_v23 = vld [vmem:[%s2075_s4 + $0x80] sm:$0xff] (!%p278_p9)   ;;  %v1650_v25 = vld [vmem:[%s2075_s4 + $0x88] sm:$0xff] (!%p278_p9)   ;;  %v1652_v27 = vld [vmem:[%s2075_s4 + $0x90] sm:$0xff] (!%p278_p9)   ;;  %vm1742_vm1 = vmmov (!%p278_p9), 0   ;;  %vm890_vm2 = vcmask (!%p278_p9), 523264   ;;  %vm1159_vm4 = vcmask (!%p278_p9), 1041409  }
  0x15   : > { %s2087_s19 = smov (!%p317_p10, %s1320_s19), 7  ;;  %1477 = vmatprep.subr.bf16.mxu1 %v1630_v8  ;;  %v1649_v24 = vld [vmem:[%s2075_s4 + $0x40] sm:$0xff]   ;;  %v1651_v26 = vld [vmem:[%s2075_s4 + $0x48] sm:$0xff]   ;;  %v1653_v28 = vld [vmem:[%s2075_s4 + $0x50] sm:$0xff]   ;;  %s313_s20 = sand.u32 1, %s1730_s28  }
  0x16   : > { %s1321_s12 = sshll.u32 %s2087_s19, 2  ;;  %v1655_v30 = vld [vmem:[%s2075_s4 + $0x58] sm:$0xff]   ;;  %v1656_v31 = vld [vmem:[%s2075_s4 + $0xa0] sm:$0xff]   ;;  %v1658_v33 = vld [vmem:[%s2075_s4 + $0xa8] sm:$0xff]   ;;  %s1319_s22 = sshll.u32 %s313_s20, 1 }
  0x17   : > { %479 = vmatpush1.bf16.msra.mxu0 %v1631_v9  ;;  %s320_s21 = scalar_lea.vmem %s2071_s0, %s1321_s12  ;;  %s1888_s10 = scalar_lea.vmem %s2072_s1, %s1321_s12  ;;  %v1657_v32 = vld [vmem:[%s2075_s4 + $0x60] sm:$0xff]   ;;  %v1659_v34 = vld [vmem:[%s2075_s4 + $0x68] sm:$0xff]   ;;  %v1660_v35 = vld [vmem:[%s2075_s4 + $0xb0] sm:$0xff]  }
  0x18   : > { %1478 = vmatpush3.bf16.msra.mxu1 %v1630_v8  ;;  %480 = vmatprep.subr.bf16.mxu0 %v1632_v10  ;;  %v1644_v15 = vld [vmem:[%s320_s21] sm:$0xff]   ;;  %v1645_v20 = vld [vmem:[%s320_s21 + $0x8] sm:$0xff]   ;;  %v1661_v36 = vld [vmem:[%s2075_s4 + $0x70] sm:$0xff]   ;;  %s1419_s24 = sshll.u32 %s1811_s9, 5  ;;  %s315_s21 = scalar_lea.vmem [#allocation3], %s1319_s22 }
  0x19   : > { %1479 = vmatprep.subr.bf16.mxu1 %v1634_v11  ;;  %1485 = vmatprep.mubr.msk.bf16.mxu1 %vm467_vm0, %v1644_v15  ;;  %v1646_v21 = vld [vmem:[%s1888_s10] sm:$0xff]   ;;  %v1647_v22 = vld [vmem:[%s1888_s10 + $0x8] sm:$0xff]   ;;  %v1662_v37 = vld [vmem:[%s2075_s4 + $0xb8] sm:$0xff]   ;;  %s1244_s25 = sshll.u32 %s315_s21, 4  ;;  %s2029_s10 = scalar_lea.hbm %s2079_s8, %s1419_s24  ;;  %s2031_s25 = int_to_ptr.vmem [resolvable:$true] %s1244_s25 }
  0x1a   : > { %v1663_v38 = vld [vmem:[%s2075_s4 + $0x78] sm:$0xff]   ;;  %v1966_v39 = vld [vmem:[%s2075_s4] sm:$0xff]   ;;  %s1231_s13 = scalar_lea.sflag [#allocation4], %s313_s20  ;;  %s1676_s9 = scalar_lea.vmem %s2031_s25, 32 }
  0x1b   : > { %481 = vmatpush1.bf16.msra.mxu0 %v1635_v12  ;;  %p1677_p11 = scmp.ne.s32.totalorder %s2031_s25, %s1676_s9  ;;  %s1744_s17 = smov [#allocation3]  }
  0x1c   : > { %1480 = vmatpush3.bf16.msra.mxu1 %v1634_v11  ;;  %482 = vmatprep.subr.bf16.mxu0 %v1636_v13  ;;  %s1680_s18 = sshll.u32 %s1744_s17, 4  ;;  %s1681_s18 = int_to_ptr.vmem [resolvable:$false] %s1680_s18 }
  0x1d   : > { %1481 = vmatprep.subr.bf16.mxu1 %v1638_v14  ;;  %p1678_p12 = pnand %p1677_p11, %p1828_p5  ;;  %s1682_s22 = scalar_lea.vmem %s1681_s18, 64 }
  0x1e   : > { %p1683_p0 = scmp.lt.s32.totalorder %s2031_s25, %s1681_s18  ;;  %p1684_p1 = scmp.lt.s32.totalorder %s1682_s22, %s1676_s9 }
  0x1f   : > { %483 = vmatpush1.bf16.msra.mxu0 %v1639_v16  ;;  %p1679_p13 = pneg %p1678_p12 }
  0x20   : > { %1482 = vmatpush3.bf16.msra.mxu1 %v1638_v14  ;;  %484 = vmatprep.subr.bf16.mxu0 %v1640_v17  ;;  %p1685_p2 = por %p1684_p1, %p1683_p0 }
  0x21   : > { %1483 = vmatprep.subr.bf16.mxu1 %v1642_v18 }
  0x22   : > { %p1686_p3 = pnand %p1685_p2, %p1679_p13 }
  0x23   : > { %485 = vmatpush1.bf16.msra.mxu0 %v1643_v19 }
  0x24   : > { %1484 = vmatpush3.bf16.msra.mxu1 %v1642_v18  ;;  %592 = vmatprep.subr.bf16.mxu0 %v1620_v0 }
  0x25   : > { %1489 = vmatprep.subr.bf16.mxu1 %v1622_v1 }
  0x26   : > { %1344 = vmatmul.mubr.msk.bf16.vlgmr.msra.gmra.mrb[0].mxu0 %vm467_vm0, %v1644_v15 }
  0x27   : > { %1486 = vmatmul.mubr.msk.bf16.vlgmr.msra.gmra.mrb[0].mxu1 %vm467_vm0, %v1645_v20  ;;  %593 = vmatpush1.bf16.msra.mxu0 %v1623_v3 }
  0x28   : > { %1490 = vmatpush3.bf16.msra.mxu1 %v1622_v1  ;;  %594 = vmatprep.subr.bf16.mxu0 %v1624_v4 }
  0x29   : > { %1491 = vmatprep.subr.bf16.mxu1 %v1626_v5  ;;  %516 = vmatprep.mubr.bf16.mxu0 %v1740_v2 }
  0x2a   : > { %1501 = vmatprep.mubr.msk.bf16.mxu1 %vm467_vm0, %v1646_v21 }
  0x2b   : > { %595 = vmatpush1.bf16.msra.mxu0 %v1627_v6 }
  0x2c   : > { %1492 = vmatpush3.bf16.msra.mxu1 %v1626_v5  ;;  %596 = vmatprep.subr.bf16.mxu0 %v1628_v7 }
  0x2d   : > { %1493 = vmatprep.subr.bf16.mxu1 %v1630_v8 }
  0x2e   : > { %1345 = vmatmul.mubr.msk.bf16.gmra.mrb[4].mxu0 %vm467_vm0, %v1645_v20 }
  0x2f   : > { %597 = vmatpush1.bf16.msra.mxu0 %v1631_v9  ;;  %624 = vmatprep.mubr.bf16.mxu0 %v1740_v2 }
  0x30   : > { %1494 = vmatpush3.bf16.msra.mxu1 %v1630_v8  ;;  %598 = vmatprep.subr.bf16.mxu0 %v1632_v10 }
  0x31   : > { %1495 = vmatprep.subr.bf16.mxu1 %v1634_v11 }
  0x33   : > { %599 = vmatpush1.bf16.msra.mxu0 %v1635_v12 }
  0x34   : > { %1496 = vmatpush3.bf16.msra.mxu1 %v1634_v11  ;;  %600 = vmatprep.subr.bf16.mxu0 %v1636_v13 }
  0x35   : > { %1497 = vmatprep.subr.bf16.mxu1 %v1638_v14 }
  0x37   : > { %601 = vmatpush1.bf16.msra.mxu0 %v1639_v16 }
  0x38   : > { %1498 = vmatpush3.bf16.msra.mxu1 %v1638_v14  ;;  %602 = vmatprep.subr.bf16.mxu0 %v1640_v17 }
  0x39   : > { %1499 = vmatprep.subr.bf16.mxu1 %v1642_v18 }
  0x3b   : > { %603 = vmatpush1.bf16.msra.mxu0 %v1643_v19 }
  0x3c   : > { %1500 = vmatpush3.bf16.msra.mxu1 %v1642_v18  ;;  %1505 = vmatprep.subr.bf16.mxu0 %v1648_v23 }
  0x3d   : > { %1525 = vmatprep.subr.bf16.mxu1 %v1649_v24 }
  0x3e   : > { %1350 = vmatmul.mubr.msk.bf16.vlgmr.msra.gmra.mrb[8].mxu0 %vm467_vm0, %v1646_v21  ;;  %v1354_v21 = vld [vmem:[%s2074_s3] ss:$0 sm:$0xff] }
  0x3f   : > { %1502 = vmatmul.mubr.msk.bf16.vlgmr.msra.gmra.mrb[4].mxu1 %vm467_vm0, %v1647_v22  ;;  %634 = vmatprep.mubr.bf16.mxu0 %v1740_v2 }
  0x40   : > { %1506 = vmatpush3.bf16.msra.mxu0 %v1648_v23  ;;  %1526 = vmatpush3.bf16.msra.mxu1 %v1649_v24 }
  0x41   : > { %1507 = vmatprep.subr.bf16.mxu0 %v1650_v25  ;;  %1527 = vmatprep.subr.bf16.mxu1 %v1651_v26 }
  0x44   : > { %1508 = vmatpush3.bf16.msra.mxu0 %v1650_v25  ;;  %1528 = vmatpush3.bf16.msra.mxu1 %v1651_v26 }
  0x45   : > { %1509 = vmatprep.subr.bf16.mxu0 %v1652_v27  ;;  %1529 = vmatprep.subr.bf16.mxu1 %v1653_v28 }
  0x46   : > { %1351 = vmatmul.mubr.msk.bf16.gmra.mrb[12].mxu0 %vm467_vm0, %v1647_v22 }
  0x48   : > { %1510 = vmatpush3.bf16.msra.mxu0 %v1652_v27  ;;  %1530 = vmatpush3.bf16.msra.mxu1 %v1653_v28 }
  0x49   : > { %1511 = vmatprep.subr.bf16.mxu0 %v1654_v29  ;;  %1531 = vmatprep.subr.bf16.mxu1 %v1655_v30 }
  0x4c   : > { %1512 = vmatpush3.bf16.msra.mxu0 %v1654_v29  ;;  %1532 = vmatpush3.bf16.msra.mxu1 %v1655_v30 }
  0x4d   : > { %1513 = vmatprep.subr.bf16.mxu0 %v1656_v31  ;;  %1533 = vmatprep.subr.bf16.mxu1 %v1657_v32 }
  0x50   : > { %1514 = vmatpush3.bf16.msra.mxu0 %v1656_v31  ;;  %1534 = vmatpush3.bf16.msra.mxu1 %v1657_v32 }
  0x51   : > { %1515 = vmatprep.subr.bf16.mxu0 %v1658_v33  ;;  %1535 = vmatprep.subr.bf16.mxu1 %v1659_v34 }
  0x54   : > { %1516 = vmatpush3.bf16.msra.mxu0 %v1658_v33  ;;  %1536 = vmatpush3.bf16.msra.mxu1 %v1659_v34 }
  0x55   : > { %1517 = vmatprep.subr.bf16.mxu0 %v1660_v35  ;;  %1537 = vmatprep.subr.bf16.mxu1 %v1661_v36 }
  0x58   : > { %1518 = vmatpush3.bf16.msra.mxu0 %v1660_v35  ;;  %1538 = vmatpush3.bf16.msra.mxu1 %v1661_v36  ;;  %v1665_v35 = vld [vmem:[%s2075_s4 + $0x8] sm:$0xff]   ;;  %v1666_v36 = vld [vmem:[%s2075_s4 + $0x10] sm:$0xff]  }
  0x59   : > { %1519 = vmatprep.subr.bf16.mxu0 %v1662_v37  ;;  %1539 = vmatprep.subr.bf16.mxu1 %v1663_v38 }
  0x5c   : > { %1520 = vmatpush3.bf16.msra.mxu0 %v1662_v37  ;;  %1540 = vmatpush3.bf16.msra.mxu1 %v1663_v38  ;;  %v1667_v37 = vld [vmem:[%s2075_s4 + $0x18] sm:$0xff]   ;;  %v1668_v38 = vld [vmem:[%s2075_s4 + $0x20] sm:$0xff]  }
  0x5d   : > { %1545 = vmatprep.subr.bf16.mxu0 %v1966_v39 }
  0xf9   : > { %v508_v40 = vpop.f32.mrb[0].mxu0 }
  0xfa   : > { %v1487_v41 = vpop.f32.mrb[0].mxu1  ;;  %v510_v42 = vpop.f32.mrb[1].mxu0 }
  0xfb   : > { %700 = vst [vmem:[#allocation2 + $0x10] sm:$0xff] %v1487_v41  ;;  %v561_v43 = vpop.f32.mrb[1].mxu1  ;;  %v512_v44 = vpop.f32.mrb[2].mxu0  ;;  %v1671_v41 = vld [vmem:[%s2075_s4 + $0x38] sm:$0xff]  }
  0xfc   : > { %698 = vst [vmem:[#allocation2] sm:$0xff] %v561_v43  ;;  %v1488_v45 = vpop.f32.mrb[2].mxu1  ;;  %v514_v46 = vpop.f32.mrb[3].mxu0  ;;  %v1741_v43 = vmov 0.0  }
  0xfd   : > { %701 = vst [vmem:[#allocation2 + $0x18] sm:$0xff] %v1488_v45  ;;  %v564_v47 = vpop.f32.mrb[3].mxu1  ;;  %1565 = vmatprep.subr.bf16.mxu1 %v1741_v43  ;;  %v1674_v45 = vld [vmem:[%s2077_s6 + $0x10] sm:$0xff]  }
  0xfe   : > { %699 = vst [vmem:[#allocation2 + $0x8] sm:$0xff] %v564_v47 }
 0x101   : > { %v518_v48 = vpop.f32.mrb[4].mxu0 }
 0x102   : > { %v520_v49 = vpop.f32.mrb[5].mxu0 }
 0x103   : > { %v522_v50 = vpop.f32.mrb[6].mxu0 }
 0x104   : > { %v524_v51 = vpop.f32.mrb[7].mxu0  ;;  %v704_v58 = vld [vmem:[#allocation2 + $0x11] sm:$0xff]  ;;  %v705_v3 = vld [vmem:[#allocation2 + $0x19] sm:$0xff] }
 0x105   : > { %v703_v57 = vld [vmem:[#allocation2 + $0x9] sm:$0xff]  ;;  %v702_v63 = vld [vmem:[#allocation2 + $0x1] sm:$0xff] }
 0x111   : > { %v626_v52 = vpop.f32.mrb[8].mxu0 }
 0x112   : > { %v1503_v53 = vpop.f32.mrb[4].mxu1  ;;  %v628_v55 = vpop.f32.mrb[9].mxu0 }
 0x113   : > { %v712_v54 = vadd.f32 %v1503_v53, %v520_v49  ;;  %v679_v56 = vpop.f32.mrb[5].mxu1  ;;  %v694_v59 = vadd.f32 %v628_v55, %v508_v40  ;;  %v630_v61 = vpop.f32.mrb[10].mxu0  ;;  %v1670_v40 = vld [vmem:[%s2075_s4 + $0x30] sm:$0xff]  }
 0x114   : > { %v710_v60 = vadd.f32 %v679_v56, %v510_v42  ;;  %v1504_v62 = vpop.f32.mrb[6].mxu1  ;;  %v632_v1 = vpop.f32.mrb[11].mxu0  ;;  %v1672_v42 = vld [vmem:[%s2077_s6] sm:$0xff]  }
 0x115   : > { %716 = vst [vmem:[#allocation2 + $0x10] sm:$0xff] %v712_v54  ;;  %v713_v0 = vadd.f32 %v1504_v62, %v524_v51  ;;  %v682_v2 = vpop.f32.mrb[7].mxu1  ;;  %v695_v4 = vadd.f32 %v632_v1, %v512_v44  ;;  %v706_v15 = vadd.f32 %v702_v63, %v694_v59  ;;  %v1673_v44 = vld [vmem:[%s2077_s6 + $0x8] sm:$0xff]   ;;  %v1101_v63 = vlaneseq }
 0x116   : > { %714 = vst [vmem:[#allocation2] sm:$0xff] %v710_v60  ;;  %v711_v5 = vadd.f32 %v682_v2, %v514_v46  ;;  %v1675_v46 = vld [vmem:[%s2077_s6 + $0x18] sm:$0xff]  }
 0x117   : > { %717 = vst [vmem:[#allocation2 + $0x18] sm:$0xff] %v713_v0  ;;  %v707_v20 = vadd.f32 %v703_v57, %v695_v4  ;;  %v1102_v0 = vshrl.u32 %v1101_v63, 7 }
 0x118   : > { %715 = vst [vmem:[#allocation2 + $0x8] sm:$0xff] %v711_v5 }
 0x119   : > { %v636_v6 = vpop.f32.mrb[12].mxu0  ;;  %vm1104_vm3 = vcmp.lt.s32.totalorder %v1102_v0, 7 }
 0x11a   : > { %v638_v7 = vpop.f32.mrb[13].mxu0 }
 0x11b   : > { %v696_v8 = vadd.f32 %v638_v7, %v518_v48  ;;  %v640_v9 = vpop.f32.mrb[14].mxu0 }
 0x11c   : > { %v642_v10 = vpop.f32.mrb[15].mxu0 }
 0x11d   : > { %v708_v12 = vadd.f32 %v704_v58, %v696_v8  ;;  %v697_v14 = vadd.f32 %v642_v10, %v522_v50 }
 0x11e   : > { %v720_v11 = vld [vmem:[#allocation2 + $0x11] sm:$0xff]  ;;  %v721_v13 = vld [vmem:[#allocation2 + $0x19] sm:$0xff] }
 0x11f   : > { %v724_v16 = vadd.f32 %v720_v11, %v636_v6  ;;  %v725_v17 = vadd.f32 %v721_v13, %v640_v9  ;;  %v718_v18 = vld [vmem:[#allocation2 + $0x1] sm:$0xff]  ;;  %v719_v19 = vld [vmem:[#allocation2 + $0x9] sm:$0xff]  ;;  %v709_v22 = vadd.f32 %v705_v3, %v697_v14  ;;  %v1743_v6 = vmov -inf  }
 0x120   : > { %v722_v23 = vadd.f32 %v718_v18, %v626_v52  ;;  %v723_v24 = vadd.f32 %v719_v19, %v630_v61  ;;  %v1111_v7 = vsel %vm890_vm2, -1e+30, %v1743_v6 }
 0x121   : > { %v728_v25 = vmax.f32 %v708_v12, %v724_v16  ;;  %v729_v26 = vmax.f32 %v709_v22, %v725_v17 }
 0x122   : > { %v726_v27 = vmax.f32 %v706_v15, %v722_v23  ;;  %v727_v28 = vmax.f32 %v707_v20, %v723_v24 }
 0x123   : > { %v739_v29 = vadd.f32 %v1354_v21, %v728_v25  ;;  %v740_v30 = vadd.f32 %v1354_v21, %v729_v26  ;;  %v1411_v26 = vld [vmem:[%s2076_s5] ss:$0 sm:$0xff] }
 0x124   : > { %v737_v31 = vadd.f32 %v1354_v21, %v726_v27  ;;  %v738_v32 = vadd.f32 %v1354_v21, %v727_v28 }
 0x125   : > { %v742_v33 = vpack.c.bf16 %v740_v30, %v739_v29 }
 0x126   : > { %v741_v34 = vpack.c.bf16 %v738_v32, %v737_v31 }
 0x128   : > { %1521 = vmatprep.mubr.bf16.mxu0 %v741_v34  ;;  %1541 = vmatprep.mubr.bf16.mxu1 %v741_v34 }
 0x129   : > { %1522 = vmatmul.mubr.bf16.vlgmr.msra.gmra.mrb[16].mxu0 %v742_v33  ;;  %1542 = vmatmul.mubr.bf16.vlgmr.msra.gmra.mrb[8].mxu1 %v742_v33 }
 0x12a   : > { %1546 = vmatpush3.bf16.msra.mxu0 %v1966_v39  ;;  %1561 = vmatprep.mubr.bf16.mxu0 %v741_v34  ;;  %v1669_v39 = vld [vmem:[%s2075_s4 + $0x28] sm:$0xff]  }
 0x12b   : > { %1547 = vmatprep.subr.bf16.mxu0 %v1665_v35  ;;  %1566 = vmatpush3.bf16.msra.mxu1 %v1672_v42 }
 0x12c   : > { %1567 = vmatprep.subr.bf16.mxu1 %v1741_v43  ;;  %1573 = vmatprep.mubr.msk.bf16.mxu1 %vm1742_vm1, %v1741_v43 }
 0x12e   : > { %1548 = vmatpush3.bf16.msra.mxu0 %v1665_v35 }
 0x12f   : > { %1549 = vmatprep.subr.bf16.mxu0 %v1666_v36  ;;  %1568 = vmatpush3.bf16.msra.mxu1 %v1673_v44 }
 0x130   : > { %1569 = vmatprep.subr.bf16.mxu1 %v1741_v43 }
 0x132   : > { %1550 = vmatpush3.bf16.msra.mxu0 %v1666_v36 }
 0x133   : > { %1551 = vmatprep.subr.bf16.mxu0 %v1667_v37  ;;  %1570 = vmatpush3.bf16.msra.mxu1 %v1674_v45 }
 0x134   : > { %1571 = vmatprep.subr.bf16.mxu1 %v1741_v43 }
 0x136   : > { %1552 = vmatpush3.bf16.msra.mxu0 %v1667_v37 }
 0x137   : > { %1553 = vmatprep.subr.bf16.mxu0 %v1668_v38  ;;  %1572 = vmatpush3.bf16.msra.mxu1 %v1675_v46 }
 0x13a   : > { %1554 = vmatpush3.bf16.msra.mxu0 %v1668_v38 }
 0x13b   : > { %1555 = vmatprep.subr.bf16.mxu0 %v1669_v39 }
 0x13e   : > { %1556 = vmatpush3.bf16.msra.mxu0 %v1669_v39  ;;  %v1412_v39 = vld [vmem:[%s2078_s7] ss:$0 sm:$0xff] }
 0x13f   : > { %1557 = vmatprep.subr.bf16.mxu0 %v1670_v40 }
 0x142   : > { %1558 = vmatpush3.bf16.msra.mxu0 %v1670_v40 }
 0x143   : > { %1559 = vmatprep.subr.bf16.mxu0 %v1671_v41 }
 0x146   : > { %1560 = vmatpush3.bf16.msra.mxu0 %v1671_v41 }
 0x149   : > { %1562 = vmatmul.mubr.bf16.vlgmr.msra.gmra.mrb[20].mxu0 %v742_v33 }
 0x1fc   : > { %v1523_v47 = vpop.f32.mrb[16].mxu0  ;;  %v1543_v48 = vpop.f32.mrb[8].mxu1 }
 0x1fd   : > { %893 = vst.msk [vmem:[#allocation2 + $0x10] sm:$0xff] %vm890_vm2, %v1523_v47  ;;  %v842_v49 = vpop.f32.mrb[17].mxu0  ;;  %v981_v50 = vpop.f32.mrb[9].mxu1 }
 0x1fe   : > { %891 = vst.msk [vmem:[#allocation2] sm:$0xff] %vm890_vm2, %v842_v49  ;;  %v1524_v51 = vpop.f32.mrb[18].mxu0  ;;  %v1544_v52 = vpop.f32.mrb[10].mxu1 }
 0x1ff   : > { %894 = vst.msk [vmem:[#allocation2 + $0x18] sm:$0xff] %vm890_vm2, %v1524_v51  ;;  %v845_v53 = vpop.f32.mrb[19].mxu0  ;;  %v984_v54 = vpop.f32.mrb[11].mxu1 }
 0x200   : > { %892 = vst.msk [vmem:[#allocation2 + $0x8] sm:$0xff] %vm890_vm2, %v845_v53 }
 0x206   : > { %v897_v55 = vld [vmem:[#allocation2 + $0x11] sm:$0xff]  ;;  %v898_v56 = vld [vmem:[#allocation2 + $0x19] sm:$0xff] }
 0x207   : > { %v990_v57 = vadd.f32 %v1543_v48, %v897_v55  ;;  %v993_v58 = vadd.f32 %v1544_v52, %v898_v56  ;;  %v895_v59 = vld [vmem:[#allocation2 + $0x1] sm:$0xff]  ;;  %v896_v60 = vld [vmem:[#allocation2 + $0x9] sm:$0xff] }
 0x208   : > { %v982_v61 = vadd.f32 %v981_v50, %v895_v59  ;;  %v985_v62 = vadd.f32 %v984_v54, %v896_v60 }
 0x209   : > { %999 = vst.msk [vmem:[#allocation2 + $0x18] sm:$0xff] %vm890_vm2, %v993_v58  ;;  %998 = vst.msk [vmem:[#allocation2 + $0x10] sm:$0xff] %vm890_vm2, %v990_v57 }
 0x20a   : > { %997 = vst.msk [vmem:[#allocation2 + $0x8] sm:$0xff] %vm890_vm2, %v985_v62  ;;  %996 = vst.msk [vmem:[#allocation2] sm:$0xff] %vm890_vm2, %v982_v61 }
 0x210   : > { %v1002_v1 = vld [vmem:[#allocation2 + $0x11] sm:$0xff] }
 0x211   : > { %v1000_v5 = vld [vmem:[#allocation2 + $0x1] sm:$0xff] }
 0x21c   : > { %v1563_v2 = vpop.f32.mrb[20].mxu0 }
 0x21d   : > { %v1095_v3 = vadd.f32 %v1563_v2, %v1002_v1  ;;  %v1086_v4 = vpop.f32.mrb[21].mxu0 }
 0x21e   : > { %v1087_v8 = vadd.f32 %v1086_v4, %v1000_v5  ;;  %v1564_v9 = vpop.f32.mrb[22].mxu0 }
 0x21f   : > { %v1108_v10 = vsel %vm1104_vm3, %v1095_v3, -1e+30  ;;  %v1089_v11 = vpop.f32.mrb[23].mxu0 }
 0x220   : > { %v1119_v12 = vsel %vm890_vm2, %v1108_v10, -inf  ;;  %v1106_v13 = vsel %vm1104_vm3, %v1087_v8, -1e+30 }
 0x221   : > { %v1121_v14 = vmax.f32 %v1119_v12, %v1111_v7  ;;  %v1110_v15 = vsel %vm890_vm2, %v1106_v13, -inf }
 0x222   : > { %v1112_v16 = vmax.f32 %v1110_v15, %v1111_v7 }
 0x223   : > { %v1122_v17 = vrot.slane %v1121_v14, 4 }
 0x224   : > { %v1113_v18 = vrot.slane %v1112_v16, 4 }
 0x225   : > { %v1123_v19 = vmax.f32 %v1121_v14, %v1122_v17 }
 0x226   : > { %v1114_v20 = vmax.f32 %v1112_v16, %v1113_v18 }
 0x227   : > { %v1124_v21 = vrot.slane %v1123_v19, 2 }
 0x228   : > { %v1115_v22 = vrot.slane %v1114_v20, 2 }
 0x229   : > { %v1125_v23 = vmax.f32 %v1123_v19, %v1124_v21 }
 0x22a   : > { %v1116_v24 = vmax.f32 %v1114_v20, %v1115_v22 }
 0x22b   : > { %v1126_v25 = vrot.slane %v1125_v23, 1 }
 0x22c   : > { %v1117_v27 = vrot.slane %v1116_v24, 1 }
 0x22d   : > { %v1127_v28 = vmax.f32 %v1125_v23, %v1126_v25 }
 0x22e   : > { %v1118_v29 = vmax.f32 %v1116_v24, %v1117_v27 }
 0x22f   : > { %v1136_v30 = vadd.f32 %v1411_v26, %v1127_v28 }
 0x230   : > { %v1135_v31 = vadd.f32 %v1411_v26, %v1118_v29 }
 0x231   : > { %v1138_v32 = vpack.c.bf16 %v1136_v30, %v1136_v30 }
 0x232   : > { %v1137_v33 = vpack.c.bf16 %v1135_v31, %v1135_v31 }
 0x233   : > { %v1157_v34 = vunpack.c.l.b16 %v1138_v32 }
 0x234   : > { %v1156_v35 = vunpack.c.l.b16 %v1137_v33 }
 0x235   : > { %v1158_v36 = vrot.slane %v1157_v34, 7 }
 0x237   : > { %v1160_v37 = vsel %vm1159_vm4, %v1158_v36, %v1156_v35 }
 0x238   : > { %v1161_v38 = vpack.c.b16 %v1160_v37, %v1160_v37 }
 0x23a   : > { %1574 = vmatmul.mubr.msk.bf16.vlgmr.msra.gmra.mrb[12].mxu1 %vm890_vm2, %v1161_v38 }
 0x30d   : > { %v1223_v40 = vpop.f32.mrb[12].mxu1 }
 0x30e   : > { %v1224_v41 = vadd.f32 %v1412_v39, %v1223_v40  ;;  %v1575_v42 = vpop.f32.mrb[13].mxu1 }
 0x30f   : > { %v1226_v43 = vpop.f32.mrb[14].mxu1 }
 0x310   : > { %1229 = vst [vmem:[%s315_s21] sm:$0x3] %v1224_v41  ;;  %v1576_v44 = vpop.f32.mrb[15].mxu1 }
 0x311   : > { %1689 = shalt.err (!%p1686_p3)
}
 0x312   : > { %s1690_s20 = scalar_lea.hbm %s2029_s10, 32  ;;  %s1694_s24 = scalar_lea.hbm %s2079_s8, 64 }
 0x313   : > { %p1691_p4 = scmp.ne.s32.totalorder %s2029_s10, %s1690_s20  ;;  %p1695_p9 = scmp.lt.u32.totalorder %s2029_s10, %s2079_s8 }
 0x314   : > { %p1696_p10 = scmp.lt.u32.totalorder %s1694_s24, %s1690_s20  ;;  %p1698_p12 = scmp.lt.u32.totalorder %s1690_s20, %s2029_s10 }
 0x315   : > { %p1692_p7 = pnand %p1691_p4, %p1828_p5 }
 0x316   : > { %p1697_p11 = por %p1696_p10, %p1695_p9 }
 0x317   : > { %p1693_p8 = pneg %p1692_p7 }
 0x318   : > { %p1699_p13 = por %p1698_p12, %p1697_p11 }
 0x31a   : > { %p1700_p0 = pnand %p1699_p13, %p1693_p8 }
 0x31c   : > { %1703 = shalt.err (!%p1700_p0)
}
 0x31d   : > { %1577 = dma.vmem_to_hbm [thread:$0]  (%p1828_p5), %s2031_s25, 32, %s2029_s10, %s1231_s13  }
 0x31e PF: > { %p1583_p1 = scmp.ge.s32.totalorder %s1738_s30, 2  ;;  %s1256_s26 = sand.u32 1, %s1726_s27  }
 0x31f   : > { %s1257_s9 = scalar_lea.sflag [#allocation4], %s1256_s26 }
 0x320   : > { %p1580_p2 = pnand %p1583_p1, %p1832_p6 }
 0x322   : > { %1721 = dma.done.wait (!%p1580_p2), %s1257_s9, 32  }
 0x323   : > { %1723 = vsyncadd (!%p1580_p2), %s1257_s9, 4294967264  ;;  %p18_p3 = scmp.ge.s32.totalorder %s1815_s11, 4   ;;  %s2082_s27 = smov %s1730_s28 }
 0x324   : > { %s2083_s28 = smov %s1734_s29  ;;  %s2084_s29 = smov %s1826_s14 }
 0x325   : > { %s2085_s30 = smov %s1815_s11  ;;  %20 = sbr.rel (!%p18_p3) target bundleno = 3 (0x3), region = 92 }
 0x32c   :  { %1262 = vsyncpa [#allocation4], 1 }
 0x32d   :  { %1264 = vsyncpa [#allocation4 + $0x1], 1 }

</bundles_post_ra>
